<compile_context>
chip_gen: v5e
topology: v5e:2x2
jax: 0.10.0
libtpu: 0.0.40
codegen_flags: <defaults>
</compile_context>

<pallas_src>
import math
import functools

import jax
import jax.numpy as jnp
from jax.experimental import pallas as pl
from jax.experimental.pallas import tpu as pltpu


def encoder_layer_kernel(
    x_ref, mask_ref,
    ln1_a_ref, ln1_b_ref,
    wq_ref, bq_ref, wk_ref, bk_ref, wv_ref, bv_ref, wo_ref, bo_ref,
    ln2_a_ref, ln2_b_ref,
    w1_ref, b1_ref, w2_ref, b2_ref,
    o_ref,
    *, num_heads, eps,
):
  f32 = jnp.float32
  bf16 = jnp.bfloat16

  x = x_ref[0].astype(f32)                  # (S, D)
  S, D = x.shape
  H = num_heads
  dk = D // H

  def layer_norm(v, a_ref, b_ref):
    # torch: a2 * (v - mean) / (std + eps) + b2, std unbiased (N-1)
    mean = jnp.mean(v, axis=-1, keepdims=True)
    diff = v - mean
    var_unbiased = jnp.sum(diff * diff, axis=-1, keepdims=True) * (1.0 / (D - 1))
    inv = pl.reciprocal(jnp.sqrt(var_unbiased) + eps, approx=True)
    return a_ref[0] * (diff * inv) + b_ref[0]

  # Additive attention mask, computed ONCE (hoisted out of per-head work).
  neg_mask = jnp.where(mask_ref[0] == 0.0, f32(-1e9), f32(0.0))      # (S, S)

  # ---- sublayer 0: self-attention on the normed input ----
  xn = layer_norm(x, ln1_a_ref, ln1_b_ref)                           # (S, D) f32
  xnh = jnp.broadcast_to(xn.astype(bf16)[None], (H, S, D))           # (H, S, D) bf16

  # Head-batched projections: weights are (H, D, dk), biases (H, 1, dk).
  q = jnp.einsum('hsd,hdk->hsk', xnh, wq_ref[...],
                 preferred_element_type=f32) + bq_ref[...]           # (H, S, dk)
  k = jnp.einsum('hsd,hdk->hsk', xnh, wk_ref[...],
                 preferred_element_type=f32) + bk_ref[...]
  v = jnp.einsum('hsd,hdk->hsk', xnh, wv_ref[...],
                 preferred_element_type=f32) + bv_ref[...]

  inv_sqrt_dk = 1.0 / math.sqrt(dk)
  scores = jnp.einsum('hqd,hkd->hqk', q.astype(bf16), k.astype(bf16),
                      preferred_element_type=f32) * inv_sqrt_dk      # (H, S, S)
  scores = scores + neg_mask[None]
  scores = scores - jnp.max(scores, axis=-1, keepdims=True)
  p = jnp.exp(scores)
  p = p * pl.reciprocal(jnp.sum(p, axis=-1, keepdims=True), approx=True)

  ctx = jnp.einsum('hqk,hkd->hqd', p.astype(bf16), v.astype(bf16),
                   preferred_element_type=f32)                       # (H, S, dk)

  # Output projection: wo is head-major (H, dk, D); sum contributions over heads.
  attn = jnp.einsum('hqd,hdm->hqm', ctx.astype(bf16), wo_ref[...],
                    preferred_element_type=f32)                      # (H, S, D)
  attn = jnp.sum(attn, axis=0) + bo_ref[0]                           # (S, D)

  x1 = x + attn                                                      # residual

  # ---- sublayer 1: feed-forward on the normed input ----
  xn2 = layer_norm(x1, ln2_a_ref, ln2_b_ref)
  h1 = jnp.dot(xn2.astype(bf16), w1_ref[...],
               preferred_element_type=f32) + b1_ref[0]               # (S, Dff)
  h1 = jnp.maximum(h1, 0.0)                                          # ReLU
  ff = jnp.dot(h1.astype(bf16), w2_ref[...],
               preferred_element_type=f32) + b2_ref[0]               # (S, D)

  o_ref[0] = (x1 + ff).astype(o_ref.dtype)


def encoder_layer(x, mask, params, *, num_heads, eps=1e-6):
  """x: (B, S, D) float32, mask: (B, S, S) float32 (0 = masked)."""
  B, S, D = x.shape
  H = num_heads
  dk = D // H
  Dff = params["w1"].shape[1]
  bf16 = jnp.bfloat16

  # Head-major weight layouts built once outside the kernel (no in-kernel
  # reshapes/transposes); matmul weights shipped as bf16 (halves DMA bytes).
  wq_h = params["wq"].reshape(D, H, dk).transpose(1, 0, 2).astype(bf16)  # (H, D, dk)
  wk_h = params["wk"].reshape(D, H, dk).transpose(1, 0, 2).astype(bf16)
  wv_h = params["wv"].reshape(D, H, dk).transpose(1, 0, 2).astype(bf16)
  wo_h = params["wo"].reshape(H, dk, D).astype(bf16)                     # (H, dk, D)
  bq_h = params["bq"].reshape(H, 1, dk)                                  # f32
  bk_h = params["bk"].reshape(H, 1, dk)
  bv_h = params["bv"].reshape(H, 1, dk)
  w1 = params["w1"].astype(bf16)
  w2 = params["w2"].astype(bf16)

  def rep_spec(shape):
    n = len(shape)
    return pl.BlockSpec(shape, lambda b, n=n: (0,) * n)

  in_specs = [
      pl.BlockSpec((1, S, D), lambda b: (b, 0, 0)),   # x
      pl.BlockSpec((1, S, S), lambda b: (b, 0, 0)),   # mask
      rep_spec((1, D)), rep_spec((1, D)),             # ln1 a2, b2
      rep_spec((H, D, dk)), rep_spec((H, 1, dk)),     # Wq, bq
      rep_spec((H, D, dk)), rep_spec((H, 1, dk)),     # Wk, bk
      rep_spec((H, D, dk)), rep_spec((H, 1, dk)),     # Wv, bv
      rep_spec((H, dk, D)), rep_spec((1, D)),         # Wo, bo
      rep_spec((1, D)), rep_spec((1, D)),             # ln2 a2, b2
      rep_spec((D, Dff)), rep_spec((1, Dff)),         # W1, b1
      rep_spec((Dff, D)), rep_spec((1, D)),           # W2, b2
  ]

  kernel = functools.partial(encoder_layer_kernel, num_heads=num_heads, eps=eps)
  return pl.pallas_call(
      kernel,
      out_shape=jax.ShapeDtypeStruct((B, S, D), x.dtype),
      grid_spec=pltpu.PrefetchScalarGridSpec(
          num_scalar_prefetch=0,
          grid=(B,),
          in_specs=in_specs,
          out_specs=pl.BlockSpec((1, S, D), lambda b: (b, 0, 0)),
      ),
      compiler_params=pltpu.CompilerParams(dimension_semantics=("parallel",)),
  )(
      x, mask,
      params["ln1_a"], params["ln1_b"],
      wq_h, bq_h, wk_h, bk_h, wv_h, bv_h, wo_h, params["bo"],
      params["ln2_a"], params["ln2_b"],
      w1, params["b1"], w2, params["b2"],
  )


def init_params(key, d_model, d_ff):
  """Deterministic synthetic params. Linear weights stored pre-transposed (in, out)."""
  ks = jax.random.split(key, 6)
  s = 0.05
  return {
      "ln1_a": jnp.ones((1, d_model), jnp.float32),
      "ln1_b": jnp.zeros((1, d_model), jnp.float32),
      "ln2_a": jnp.ones((1, d_model), jnp.float32),
      "ln2_b": jnp.zeros((1, d_model), jnp.float32),
      "wq": s * jax.random.normal(ks[0], (d_model, d_model), jnp.float32),
      "wk": s * jax.random.normal(ks[1], (d_model, d_model), jnp.float32),
      "wv": s * jax.random.normal(ks[2], (d_model, d_model), jnp.float32),
      "wo": s * jax.random.normal(ks[3], (d_model, d_model), jnp.float32),
      "bq": jnp.zeros((1, d_model), jnp.float32),
      "bk": jnp.zeros((1, d_model), jnp.float32),
      "bv": jnp.zeros((1, d_model), jnp.float32),
      "bo": jnp.zeros((1, d_model), jnp.float32),
      "w1": s * jax.random.normal(ks[4], (d_model, d_ff), jnp.float32),
      "b1": 0.01 * jnp.ones((1, d_ff), jnp.float32),
      "w2": s * jax.random.normal(ks[5], (d_ff, d_model), jnp.float32),
      "b2": 0.01 * jnp.ones((1, d_model), jnp.float32),
  }


def encoder_layer_ref(x, mask, params, *, num_heads, eps=1e-6):
  """Pure-JAX f32 reference matching the PyTorch forward (eval mode)."""
  B, S, D = x.shape
  dk = D // num_heads

  def ln(v, a, b):
    mean = jnp.mean(v, -1, keepdims=True)
    diff = v - mean
    std = jnp.sqrt(jnp.sum(diff * diff, -1, keepdims=True) / (D - 1))
    return a[0] * diff / (std + eps) + b[0]

  xn = ln(x, params["ln1_a"], params["ln1_b"])
  q = xn @ params["wq"] + params["bq"][0]
  k = xn @ params["wk"] + params["bk"][0]
  v = xn @ params["wv"] + params["bv"][0]
  q = q.reshape(B, S, num_heads, dk).transpose(0, 2, 1, 3)
  k = k.reshape(B, S, num_heads, dk).transpose(0, 2, 1, 3)
  v = v.reshape(B, S, num_heads, dk).transpose(0, 2, 1, 3)
  scores = jnp.einsum("bhqd,bhkd->bhqk", q, k) / math.sqrt(dk)
  scores = jnp.where(mask[:, None] == 0.0, -1e9, scores)
  p = jax.nn.softmax(scores, axis=-1)
  attn = jnp.einsum("bhqk,bhkd->bhqd", p, v).transpose(0, 2, 1, 3).reshape(B, S, D)
  attn = attn @ params["wo"] + params["bo"][0]
  x1 = x + attn
  xn2 = ln(x1, params["ln2_a"], params["ln2_b"])
  ff = jnp.maximum(xn2 @ params["w1"] + params["b1"][0], 0.0) @ params["w2"] + params["b2"][0]
  return x1 + ff


if __name__ == "__main__":
  B, S, D, H, Dff = 2, 8, 32, 4, 64
  key = jax.random.PRNGKey(0)
  kx, kp = jax.random.split(key)

  x = jax.random.normal(kx, (B, S, D), jnp.float32)
  # mask: (B, S, S); block attention to the last position for batch element 1
  mask = jnp.ones((B, S, S), jnp.float32)
  mask = mask.at[1, :, -1].set(0.0)

  params = init_params(kp, D, Dff)

  out = encoder_layer(x, mask, params, num_heads=H)
  out = jax.block_until_ready(out)

  ref = encoder_layer_ref(x, mask, params, num_heads=H)
  assert out.shape == (B, S, D)
  # bf16 MXU operands + approx reciprocals -> loosened tolerance vs f32 reference.
  max_err = float(jnp.max(jnp.abs(out - ref)))
  assert jnp.allclose(out, ref, atol=2e-2, rtol=2e-2), max_err

  print("KERNEL_OK")
</pallas_src>

<mosaic_0001>
module attributes {stable_mosaic.version = 11 : i64} {
  func.func @encoder_layer_kernel(%arg0: i32, %arg1: memref<1x8x32xf32, #tpu.memory_space<vmem>>, %arg2: memref<1x8x8xf32, #tpu.memory_space<vmem>>, %arg3: memref<1x32xf32, #tpu.memory_space<vmem>>, %arg4: memref<1x32xf32, #tpu.memory_space<vmem>>, %arg5: memref<4x32x8xbf16, #tpu.memory_space<vmem>>, %arg6: memref<4x1x8xf32, #tpu.memory_space<vmem>>, %arg7: memref<4x32x8xbf16, #tpu.memory_space<vmem>>, %arg8: memref<4x1x8xf32, #tpu.memory_space<vmem>>, %arg9: memref<4x32x8xbf16, #tpu.memory_space<vmem>>, %arg10: memref<4x1x8xf32, #tpu.memory_space<vmem>>, %arg11: memref<4x8x32xbf16, #tpu.memory_space<vmem>>, %arg12: memref<1x32xf32, #tpu.memory_space<vmem>>, %arg13: memref<1x32xf32, #tpu.memory_space<vmem>>, %arg14: memref<1x32xf32, #tpu.memory_space<vmem>>, %arg15: memref<32x64xbf16, #tpu.memory_space<vmem>>, %arg16: memref<1x64xf32, #tpu.memory_space<vmem>>, %arg17: memref<64x32xbf16, #tpu.memory_space<vmem>>, %arg18: memref<1x32xf32, #tpu.memory_space<vmem>>, %arg19: memref<1x8x32xf32, #tpu.memory_space<vmem>>) attributes {dimension_semantics = [#tpu.dimension_semantics<parallel>], iteration_bounds = array<i64: 2>, scalar_prefetch = 0 : i64, scratch_operands = 0 : i64, tpu.core_type = #tpu.core_type<tc>, window_params = [{transform_indices = @transform_0, window_bounds = array<i64: 1, 8, 32>}, {transform_indices = @transform_1, window_bounds = array<i64: 1, 8, 8>}, {pipeline_mode = #tpu.pipeline_mode<synchronous>, transform_indices = @transform_2, window_bounds = array<i64: 1, 32>}, {pipeline_mode = #tpu.pipeline_mode<synchronous>, transform_indices = @transform_3, window_bounds = array<i64: 1, 32>}, {pipeline_mode = #tpu.pipeline_mode<synchronous>, transform_indices = @transform_4, window_bounds = array<i64: 4, 32, 8>}, {pipeline_mode = #tpu.pipeline_mode<synchronous>, transform_indices = @transform_5, window_bounds = array<i64: 4, 1, 8>}, {pipeline_mode = #tpu.pipeline_mode<synchronous>, transform_indices = @transform_6, window_bounds = array<i64: 4, 32, 8>}, {pipeline_mode = #tpu.pipeline_mode<synchronous>, transform_indices = @transform_7, window_bounds = array<i64: 4, 1, 8>}, {pipeline_mode = #tpu.pipeline_mode<synchronous>, transform_indices = @transform_8, window_bounds = array<i64: 4, 32, 8>}, {pipeline_mode = #tpu.pipeline_mode<synchronous>, transform_indices = @transform_9, window_bounds = array<i64: 4, 1, 8>}, {pipeline_mode = #tpu.pipeline_mode<synchronous>, transform_indices = @transform_10, window_bounds = array<i64: 4, 8, 32>}, {pipeline_mode = #tpu.pipeline_mode<synchronous>, transform_indices = @transform_11, window_bounds = array<i64: 1, 32>}, {pipeline_mode = #tpu.pipeline_mode<synchronous>, transform_indices = @transform_12, window_bounds = array<i64: 1, 32>}, {pipeline_mode = #tpu.pipeline_mode<synchronous>, transform_indices = @transform_13, window_bounds = array<i64: 1, 32>}, {pipeline_mode = #tpu.pipeline_mode<synchronous>, transform_indices = @transform_14, window_bounds = array<i64: 32, 64>}, {pipeline_mode = #tpu.pipeline_mode<synchronous>, transform_indices = @transform_15, window_bounds = array<i64: 1, 64>}, {pipeline_mode = #tpu.pipeline_mode<synchronous>, transform_indices = @transform_16, window_bounds = array<i64: 64, 32>}, {pipeline_mode = #tpu.pipeline_mode<synchronous>, transform_indices = @transform_17, window_bounds = array<i64: 1, 32>}, {transform_indices = @transform_18, window_bounds = array<i64: 1, 8, 32>}]} {
    %c0 = arith.constant 0 : index
    %c0_0 = arith.constant 0 : index
    %c0_1 = arith.constant 0 : index
    %0 = vector.load %arg1[%c0, %c0_0, %c0_1] : memref<1x8x32xf32, #tpu.memory_space<vmem>>, vector<1x8x32xf32>
    %1 = vector.shape_cast %0 : vector<1x8x32xf32> to vector<8x32xf32>
    %c0_2 = arith.constant 0 : index
    %c0_3 = arith.constant 0 : index
    %c0_4 = arith.constant 0 : index
    %2 = vector.load %arg2[%c0_2, %c0_3, %c0_4] : memref<1x8x8xf32, #tpu.memory_space<vmem>>, vector<1x8x8xf32>
    %3 = vector.shape_cast %2 : vector<1x8x8xf32> to vector<8x8xf32>
    %cst = arith.constant 0.000000e+00 : f32
    %4 = vector.broadcast %cst : f32 to vector<8x8xf32>
    %5 = arith.cmpf oeq, %3, %4 : vector<8x8xf32>
    %cst_5 = arith.constant -1.000000e+09 : f32
    %cst_6 = arith.constant 0.000000e+00 : f32
    %6 = vector.broadcast %cst_5 : f32 to vector<8x8xf32>
    %7 = vector.broadcast %cst_6 : f32 to vector<8x8xf32>
    %8 = arith.select %5, %6, %7 : vector<8x8xi1>, vector<8x8xf32>
    %cst_7 = arith.constant dense<0.000000e+00> : vector<8xf32>
    %9 = vector.multi_reduction <add>, %1, %cst_7 [1] : vector<8x32xf32> to vector<8xf32>
    %10 = vector.shape_cast %9 : vector<8xf32> to vector<8x1xf32>
    %cst_8 = arith.constant 3.200000e+01 : f32
    %11 = vector.broadcast %cst_8 : f32 to vector<8x1xf32>
    %12 = arith.divf %10, %11 : vector<8x1xf32>
    %13 = vector.broadcast %12 : vector<8x1xf32> to vector<8x32xf32>
    %14 = arith.subf %1, %13 : vector<8x32xf32>
    %15 = arith.mulf %14, %14 : vector<8x32xf32>
    %cst_9 = arith.constant dense<0.000000e+00> : vector<8xf32>
    %16 = vector.multi_reduction <add>, %15, %cst_9 [1] : vector<8x32xf32> to vector<8xf32>
    %17 = vector.shape_cast %16 : vector<8xf32> to vector<8x1xf32>
    %cst_10 = arith.constant 0.0322580636 : f32
    %18 = vector.broadcast %cst_10 : f32 to vector<8x1xf32>
    %19 = arith.mulf %17, %18 : vector<8x1xf32>
    %20 = math.sqrt %19 : vector<8x1xf32>
    %cst_11 = arith.constant 9.99999997E-7 : f32
    %21 = vector.broadcast %cst_11 : f32 to vector<8x1xf32>
    %22 = arith.addf %20, %21 : vector<8x1xf32>
    %23 = tpu.reciprocal %22 {approx = true} : vector<8x1xf32> -> vector<8x1xf32>
    %c0_12 = arith.constant 0 : index
    %c0_13 = arith.constant 0 : index
    %24 = vector.load %arg3[%c0_12, %c0_13] : memref<1x32xf32, #tpu.memory_space<vmem>>, vector<1x32xf32>
    %25 = vector.shape_cast %24 : vector<1x32xf32> to vector<32xf32>
    %26 = vector.broadcast %23 : vector<8x1xf32> to vector<8x32xf32>
    %27 = arith.mulf %14, %26 : vector<8x32xf32>
    %28 = vector.shape_cast %25 : vector<32xf32> to vector<1x32xf32>
    %29 = vector.broadcast %28 : vector<1x32xf32> to vector<8x32xf32>
    %30 = arith.mulf %29, %27 : vector<8x32xf32>
    %c0_14 = arith.constant 0 : index
    %c0_15 = arith.constant 0 : index
    %31 = vector.load %arg4[%c0_14, %c0_15] : memref<1x32xf32, #tpu.memory_space<vmem>>, vector<1x32xf32>
    %32 = vector.shape_cast %31 : vector<1x32xf32> to vector<32xf32>
    %33 = vector.shape_cast %32 : vector<32xf32> to vector<1x32xf32>
    %34 = vector.broadcast %33 : vector<1x32xf32> to vector<8x32xf32>
    %35 = arith.addf %30, %34 : vector<8x32xf32>
    %36 = arith.truncf %35 : vector<8x32xf32> to vector<8x32xbf16>
    %37 = vector.shape_cast %36 : vector<8x32xbf16> to vector<1x8x32xbf16>
    %38 = vector.shape_cast %37 : vector<1x8x32xbf16> to vector<1x8x32xbf16>
    %39 = vector.broadcast %38 : vector<1x8x32xbf16> to vector<4x8x32xbf16>
    %c0_16 = arith.constant 0 : index
    %c0_17 = arith.constant 0 : index
    %c0_18 = arith.constant 0 : index
    %40 = vector.load %arg5[%c0_16, %c0_17, %c0_18] : memref<4x32x8xbf16, #tpu.memory_space<vmem>>, vector<4x32x8xbf16>
    "tpu.trace_start"() <{level = 10 : i32, message = "hsd,hdk->hsk"}> : () -> ()
    %cst_19 = arith.constant dense<0.000000e+00> : vector<4x8x8xf32>
    %41 = tpu.matmul %39, %40, %cst_19 {dimension_numbers = #tpu.dot_dimension_numbers<[2], [1], [1], [2], [0, 0, 0, 1, 1, 2], [0], [0]>} : vector<4x8x32xbf16>, vector<4x32x8xbf16>, vector<4x8x8xf32> -> vector<4x8x8xf32>
    "tpu.trace_stop"() : () -> ()
    %c0_20 = arith.constant 0 : index
    %c0_21 = arith.constant 0 : index
    %c0_22 = arith.constant 0 : index
    %42 = vector.load %arg6[%c0_20, %c0_21, %c0_22] : memref<4x1x8xf32, #tpu.memory_space<vmem>>, vector<4x1x8xf32>
    %43 = vector.broadcast %42 : vector<4x1x8xf32> to vector<4x8x8xf32>
    %44 = arith.addf %41, %43 : vector<4x8x8xf32>
    %c0_23 = arith.constant 0 : index
    %c0_24 = arith.constant 0 : index
    %c0_25 = arith.constant 0 : index
    %45 = vector.load %arg7[%c0_23, %c0_24, %c0_25] : memref<4x32x8xbf16, #tpu.memory_space<vmem>>, vector<4x32x8xbf16>
    "tpu.trace_start"() <{level = 10 : i32, message = "hsd,hdk->hsk"}> : () -> ()
    %cst_26 = arith.constant dense<0.000000e+00> : vector<4x8x8xf32>
    %46 = tpu.matmul %39, %45, %cst_26 {dimension_numbers = #tpu.dot_dimension_numbers<[2], [1], [1], [2], [0, 0, 0, 1, 1, 2], [0], [0]>} : vector<4x8x32xbf16>, vector<4x32x8xbf16>, vector<4x8x8xf32> -> vector<4x8x8xf32>
    "tpu.trace_stop"() : () -> ()
    %c0_27 = arith.constant 0 : index
    %c0_28 = arith.constant 0 : index
    %c0_29 = arith.constant 0 : index
    %47 = vector.load %arg8[%c0_27, %c0_28, %c0_29] : memref<4x1x8xf32, #tpu.memory_space<vmem>>, vector<4x1x8xf32>
    %48 = vector.broadcast %47 : vector<4x1x8xf32> to vector<4x8x8xf32>
    %49 = arith.addf %46, %48 : vector<4x8x8xf32>
    %c0_30 = arith.constant 0 : index
    %c0_31 = arith.constant 0 : index
    %c0_32 = arith.constant 0 : index
    %50 = vector.load %arg9[%c0_30, %c0_31, %c0_32] : memref<4x32x8xbf16, #tpu.memory_space<vmem>>, vector<4x32x8xbf16>
    "tpu.trace_start"() <{level = 10 : i32, message = "hsd,hdk->hsk"}> : () -> ()
    %cst_33 = arith.constant dense<0.000000e+00> : vector<4x8x8xf32>
    %51 = tpu.matmul %39, %50, %cst_33 {dimension_numbers = #tpu.dot_dimension_numbers<[2], [1], [1], [2], [0, 0, 0, 1, 1, 2], [0], [0]>} : vector<4x8x32xbf16>, vector<4x32x8xbf16>, vector<4x8x8xf32> -> vector<4x8x8xf32>
    "tpu.trace_stop"() : () -> ()
    %c0_34 = arith.constant 0 : index
    %c0_35 = arith.constant 0 : index
    %c0_36 = arith.constant 0 : index
    %52 = vector.load %arg10[%c0_34, %c0_35, %c0_36] : memref<4x1x8xf32, #tpu.memory_space<vmem>>, vector<4x1x8xf32>
    %53 = vector.broadcast %52 : vector<4x1x8xf32> to vector<4x8x8xf32>
    %54 = arith.addf %51, %53 : vector<4x8x8xf32>
    %55 = arith.truncf %44 : vector<4x8x8xf32> to vector<4x8x8xbf16>
    %56 = arith.truncf %49 : vector<4x8x8xf32> to vector<4x8x8xbf16>
    "tpu.trace_start"() <{level = 10 : i32, message = "hqd,hkd->hqk"}> : () -> ()
    %cst_37 = arith.constant dense<0.000000e+00> : vector<4x8x8xf32>
    %57 = tpu.matmul %55, %56, %cst_37 {dimension_numbers = #tpu.dot_dimension_numbers<[2], [2], [1], [1], [0, 0, 0, 1, 1, 1], [0], [0]>} : vector<4x8x8xbf16>, vector<4x8x8xbf16>, vector<4x8x8xf32> -> vector<4x8x8xf32>
    "tpu.trace_stop"() : () -> ()
    %cst_38 = arith.constant 0.353553385 : f32
    %58 = vector.broadcast %cst_38 : f32 to vector<4x8x8xf32>
    %59 = arith.mulf %57, %58 : vector<4x8x8xf32>
    %60 = vector.shape_cast %8 : vector<8x8xf32> to vector<1x8x8xf32>
    %61 = vector.broadcast %60 : vector<1x8x8xf32> to vector<4x8x8xf32>
    %62 = arith.addf %59, %61 : vector<4x8x8xf32>
    %cst_39 = arith.constant dense<0xFF800000> : vector<4x8xf32>
    %63 = vector.multi_reduction <maximumf>, %62, %cst_39 [2] : vector<4x8x8xf32> to vector<4x8xf32>
    %64 = vector.shape_cast %63 : vector<4x8xf32> to vector<4x8x1xf32>
    %65 = vector.broadcast %64 : vector<4x8x1xf32> to vector<4x8x8xf32>
    %66 = arith.subf %62, %65 : vector<4x8x8xf32>
    %67 = math.exp %66 : vector<4x8x8xf32>
    %cst_40 = arith.constant dense<0.000000e+00> : vector<4x8xf32>
    %68 = vector.multi_reduction <add>, %67, %cst_40 [2] : vector<4x8x8xf32> to vector<4x8xf32>
    %69 = vector.shape_cast %68 : vector<4x8xf32> to vector<4x8x1xf32>
    %70 = tpu.reciprocal %69 {approx = true} : vector<4x8x1xf32> -> vector<4x8x1xf32>
    %71 = vector.broadcast %70 : vector<4x8x1xf32> to vector<4x8x8xf32>
    %72 = arith.mulf %67, %71 : vector<4x8x8xf32>
    %73 = arith.truncf %72 : vector<4x8x8xf32> to vector<4x8x8xbf16>
    %74 = arith.truncf %54 : vector<4x8x8xf32> to vector<4x8x8xbf16>
    "tpu.trace_start"() <{level = 10 : i32, message = "hqk,hkd->hqd"}> : () -> ()
    %cst_41 = arith.constant dense<0.000000e+00> : vector<4x8x8xf32>
    %75 = tpu.matmul %73, %74, %cst_41 {dimension_numbers = #tpu.dot_dimension_numbers<[2], [1], [1], [2], [0, 0, 0, 1, 1, 2], [0], [0]>} : vector<4x8x8xbf16>, vector<4x8x8xbf16>, vector<4x8x8xf32> -> vector<4x8x8xf32>
    "tpu.trace_stop"() : () -> ()
    %76 = arith.truncf %75 : vector<4x8x8xf32> to vector<4x8x8xbf16>
    %c0_42 = arith.constant 0 : index
    %c0_43 = arith.constant 0 : index
    %c0_44 = arith.constant 0 : index
    %77 = vector.load %arg11[%c0_42, %c0_43, %c0_44] : memref<4x8x32xbf16, #tpu.memory_space<vmem>>, vector<4x8x32xbf16>
    "tpu.trace_start"() <{level = 10 : i32, message = "hqd,hdm->hqm"}> : () -> ()
    %cst_45 = arith.constant dense<0.000000e+00> : vector<4x8x32xf32>
    %78 = tpu.matmul %76, %77, %cst_45 {dimension_numbers = #tpu.dot_dimension_numbers<[2], [1], [1], [2], [0, 0, 0, 1, 1, 2], [0], [0]>} : vector<4x8x8xbf16>, vector<4x8x32xbf16>, vector<4x8x32xf32> -> vector<4x8x32xf32>
    "tpu.trace_stop"() : () -> ()
    %cst_46 = arith.constant dense<0.000000e+00> : vector<8x32xf32>
    %79 = vector.multi_reduction <add>, %78, %cst_46 [0] : vector<4x8x32xf32> to vector<8x32xf32>
    %c0_47 = arith.constant 0 : index
    %c0_48 = arith.constant 0 : index
    %80 = vector.load %arg12[%c0_47, %c0_48] : memref<1x32xf32, #tpu.memory_space<vmem>>, vector<1x32xf32>
    %81 = vector.shape_cast %80 : vector<1x32xf32> to vector<32xf32>
    %82 = vector.shape_cast %81 : vector<32xf32> to vector<1x32xf32>
    %83 = vector.broadcast %82 : vector<1x32xf32> to vector<8x32xf32>
    %84 = arith.addf %79, %83 : vector<8x32xf32>
    %85 = arith.addf %1, %84 : vector<8x32xf32>
    %cst_49 = arith.constant dense<0.000000e+00> : vector<8xf32>
    %86 = vector.multi_reduction <add>, %85, %cst_49 [1] : vector<8x32xf32> to vector<8xf32>
    %87 = vector.shape_cast %86 : vector<8xf32> to vector<8x1xf32>
    %cst_50 = arith.constant 3.200000e+01 : f32
    %88 = vector.broadcast %cst_50 : f32 to vector<8x1xf32>
    %89 = arith.divf %87, %88 : vector<8x1xf32>
    %90 = vector.broadcast %89 : vector<8x1xf32> to vector<8x32xf32>
    %91 = arith.subf %85, %90 : vector<8x32xf32>
    %92 = arith.mulf %91, %91 : vector<8x32xf32>
    %cst_51 = arith.constant dense<0.000000e+00> : vector<8xf32>
    %93 = vector.multi_reduction <add>, %92, %cst_51 [1] : vector<8x32xf32> to vector<8xf32>
    %94 = vector.shape_cast %93 : vector<8xf32> to vector<8x1xf32>
    %cst_52 = arith.constant 0.0322580636 : f32
    %95 = vector.broadcast %cst_52 : f32 to vector<8x1xf32>
    %96 = arith.mulf %94, %95 : vector<8x1xf32>
    %97 = math.sqrt %96 : vector<8x1xf32>
    %cst_53 = arith.constant 9.99999997E-7 : f32
    %98 = vector.broadcast %cst_53 : f32 to vector<8x1xf32>
    %99 = arith.addf %97, %98 : vector<8x1xf32>
    %100 = tpu.reciprocal %99 {approx = true} : vector<8x1xf32> -> vector<8x1xf32>
    %c0_54 = arith.constant 0 : index
    %c0_55 = arith.constant 0 : index
    %101 = vector.load %arg13[%c0_54, %c0_55] : memref<1x32xf32, #tpu.memory_space<vmem>>, vector<1x32xf32>
    %102 = vector.shape_cast %101 : vector<1x32xf32> to vector<32xf32>
    %103 = vector.broadcast %100 : vector<8x1xf32> to vector<8x32xf32>
    %104 = arith.mulf %91, %103 : vector<8x32xf32>
    %105 = vector.shape_cast %102 : vector<32xf32> to vector<1x32xf32>
    %106 = vector.broadcast %105 : vector<1x32xf32> to vector<8x32xf32>
    %107 = arith.mulf %106, %104 : vector<8x32xf32>
    %c0_56 = arith.constant 0 : index
    %c0_57 = arith.constant 0 : index
    %108 = vector.load %arg14[%c0_56, %c0_57] : memref<1x32xf32, #tpu.memory_space<vmem>>, vector<1x32xf32>
    %109 = vector.shape_cast %108 : vector<1x32xf32> to vector<32xf32>
    %110 = vector.shape_cast %109 : vector<32xf32> to vector<1x32xf32>
    %111 = vector.broadcast %110 : vector<1x32xf32> to vector<8x32xf32>
    %112 = arith.addf %107, %111 : vector<8x32xf32>
    %113 = arith.truncf %112 : vector<8x32xf32> to vector<8x32xbf16>
    %c0_58 = arith.constant 0 : index
    %c0_59 = arith.constant 0 : index
    %114 = vector.load %arg15[%c0_58, %c0_59] : memref<32x64xbf16, #tpu.memory_space<vmem>>, vector<32x64xbf16>
    %cst_60 = arith.constant dense<0.000000e+00> : vector<8x64xf32>
    %115 = tpu.matmul %113, %114, %cst_60 {dimension_numbers = #tpu.dot_dimension_numbers<[1], [0], [0], [1], [0, 0, 1, 1], [], []>} : vector<8x32xbf16>, vector<32x64xbf16>, vector<8x64xf32> -> vector<8x64xf32>
    %c0_61 = arith.constant 0 : index
    %c0_62 = arith.constant 0 : index
    %116 = vector.load %arg16[%c0_61, %c0_62] : memref<1x64xf32, #tpu.memory_space<vmem>>, vector<1x64xf32>
    %117 = vector.shape_cast %116 : vector<1x64xf32> to vector<64xf32>
    %118 = vector.shape_cast %117 : vector<64xf32> to vector<1x64xf32>
    %119 = vector.broadcast %118 : vector<1x64xf32> to vector<8x64xf32>
    %120 = arith.addf %115, %119 : vector<8x64xf32>
    %cst_63 = arith.constant 0.000000e+00 : f32
    %121 = vector.broadcast %cst_63 : f32 to vector<8x64xf32>
    %122 = arith.maximumf %120, %121 : vector<8x64xf32>
    %123 = arith.truncf %122 : vector<8x64xf32> to vector<8x64xbf16>
    %c0_64 = arith.constant 0 : index
    %c0_65 = arith.constant 0 : index
    %124 = vector.load %arg17[%c0_64, %c0_65] : memref<64x32xbf16, #tpu.memory_space<vmem>>, vector<64x32xbf16>
    %cst_66 = arith.constant dense<0.000000e+00> : vector<8x32xf32>
    %125 = tpu.matmul %123, %124, %cst_66 {dimension_numbers = #tpu.dot_dimension_numbers<[1], [0], [0], [1], [0, 0, 1, 1], [], []>} : vector<8x64xbf16>, vector<64x32xbf16>, vector<8x32xf32> -> vector<8x32xf32>
    %c0_67 = arith.constant 0 : index
    %c0_68 = arith.constant 0 : index
    %126 = vector.load %arg18[%c0_67, %c0_68] : memref<1x32xf32, #tpu.memory_space<vmem>>, vector<1x32xf32>
    %127 = vector.shape_cast %126 : vector<1x32xf32> to vector<32xf32>
    %128 = vector.shape_cast %127 : vector<32xf32> to vector<1x32xf32>
    %129 = vector.broadcast %128 : vector<1x32xf32> to vector<8x32xf32>
    %130 = arith.addf %125, %129 : vector<8x32xf32>
    %131 = arith.addf %85, %130 : vector<8x32xf32>
    %c0_69 = arith.constant 0 : index
    %c0_70 = arith.constant 0 : index
    %c0_71 = arith.constant 0 : index
    %132 = vector.load %arg19[%c0_69, %c0_70, %c0_71] : memref<1x8x32xf32, #tpu.memory_space<vmem>>, vector<1x8x32xf32>
    %133 = vector.shape_cast %132 : vector<1x8x32xf32> to vector<8x32xf32>
    %134 = vector.shape_cast %131 : vector<8x32xf32> to vector<1x8x32xf32>
    tpu.vector_store %arg19[%c0_69, %c0_70, %c0_71], %134 {strides = array<i32>} : memref<1x8x32xf32, #tpu.memory_space<vmem>>, vector<1x8x32xf32>,
    return
  }
  func.func @transform_0(%arg0: i32) -> (i32, i32, i32) {
    %c0_i32 = arith.constant 0 : i32
    %c0_i32_0 = arith.constant 0 : i32
    %c0_i32_1 = arith.constant 0 : i32
    return %arg0, %c0_i32, %c0_i32_0 : i32, i32, i32
  }
  func.func @transform_1(%arg0: i32) -> (i32, i32, i32) {
    %c0_i32 = arith.constant 0 : i32
    %c0_i32_0 = arith.constant 0 : i32
    %c0_i32_1 = arith.constant 0 : i32
    return %arg0, %c0_i32, %c0_i32_0 : i32, i32, i32
  }
  func.func @transform_2(%arg0: i32) -> (i32, i32) {
    %c0_i32 = arith.constant 0 : i32
    %c0_i32_0 = arith.constant 0 : i32
    %c0_i32_1 = arith.constant 0 : i32
    return %c0_i32, %c0_i32_0 : i32, i32
  }
  func.func @transform_3(%arg0: i32) -> (i32, i32) {
    %c0_i32 = arith.constant 0 : i32
    %c0_i32_0 = arith.constant 0 : i32
    %c0_i32_1 = arith.constant 0 : i32
    return %c0_i32, %c0_i32_0 : i32, i32
  }
  func.func @transform_4(%arg0: i32) -> (i32, i32, i32) {
    %c0_i32 = arith.constant 0 : i32
    %c0_i32_0 = arith.constant 0 : i32
    %c0_i32_1 = arith.constant 0 : i32
    %c0_i32_2 = arith.constant 0 : i32
    return %c0_i32, %c0_i32_0, %c0_i32_1 : i32, i32, i32
  }
  func.func @transform_5(%arg0: i32) -> (i32, i32, i32) {
    %c0_i32 = arith.constant 0 : i32
    %c0_i32_0 = arith.constant 0 : i32
    %c0_i32_1 = arith.constant 0 : i32
    %c0_i32_2 = arith.constant 0 : i32
    return %c0_i32, %c0_i32_0, %c0_i32_1 : i32, i32, i32
  }
  func.func @transform_6(%arg0: i32) -> (i32, i32, i32) {
    %c0_i32 = arith.constant 0 : i32
    %c0_i32_0 = arith.constant 0 : i32
    %c0_i32_1 = arith.constant 0 : i32
    %c0_i32_2 = arith.constant 0 : i32
    return %c0_i32, %c0_i32_0, %c0_i32_1 : i32, i32, i32
  }
  func.func @transform_7(%arg0: i32) -> (i32, i32, i32) {
    %c0_i32 = arith.constant 0 : i32
    %c0_i32_0 = arith.constant 0 : i32
    %c0_i32_1 = arith.constant 0 : i32
    %c0_i32_2 = arith.constant 0 : i32
    return %c0_i32, %c0_i32_0, %c0_i32_1 : i32, i32, i32
  }
  func.func @transform_8(%arg0: i32) -> (i32, i32, i32) {
    %c0_i32 = arith.constant 0 : i32
    %c0_i32_0 = arith.constant 0 : i32
    %c0_i32_1 = arith.constant 0 : i32
    %c0_i32_2 = arith.constant 0 : i32
    return %c0_i32, %c0_i32_0, %c0_i32_1 : i32, i32, i32
  }
  func.func @transform_9(%arg0: i32) -> (i32, i32, i32) {
    %c0_i32 = arith.constant 0 : i32
    %c0_i32_0 = arith.constant 0 : i32
    %c0_i32_1 = arith.constant 0 : i32
    %c0_i32_2 = arith.constant 0 : i32
    return %c0_i32, %c0_i32_0, %c0_i32_1 : i32, i32, i32
  }
  func.func @transform_10(%arg0: i32) -> (i32, i32, i32) {
    %c0_i32 = arith.constant 0 : i32
    %c0_i32_0 = arith.constant 0 : i32
    %c0_i32_1 = arith.constant 0 : i32
    %c0_i32_2 = arith.constant 0 : i32
    return %c0_i32, %c0_i32_0, %c0_i32_1 : i32, i32, i32
  }
  func.func @transform_11(%arg0: i32) -> (i32, i32) {
    %c0_i32 = arith.constant 0 : i32
    %c0_i32_0 = arith.constant 0 : i32
    %c0_i32_1 = arith.constant 0 : i32
    return %c0_i32, %c0_i32_0 : i32, i32
  }
  func.func @transform_12(%arg0: i32) -> (i32, i32) {
    %c0_i32 = arith.constant 0 : i32
    %c0_i32_0 = arith.constant 0 : i32
    %c0_i32_1 = arith.constant 0 : i32
    return %c0_i32, %c0_i32_0 : i32, i32
  }
  func.func @transform_13(%arg0: i32) -> (i32, i32) {
    %c0_i32 = arith.constant 0 : i32
    %c0_i32_0 = arith.constant 0 : i32
    %c0_i32_1 = arith.constant 0 : i32
    return %c0_i32, %c0_i32_0 : i32, i32
  }
  func.func @transform_14(%arg0: i32) -> (i32, i32) {
    %c0_i32 = arith.constant 0 : i32
    %c0_i32_0 = arith.constant 0 : i32
    %c0_i32_1 = arith.constant 0 : i32
    return %c0_i32, %c0_i32_0 : i32, i32
  }
  func.func @transform_15(%arg0: i32) -> (i32, i32) {
    %c0_i32 = arith.constant 0 : i32
    %c0_i32_0 = arith.constant 0 : i32
    %c0_i32_1 = arith.constant 0 : i32
    return %c0_i32, %c0_i32_0 : i32, i32
  }
  func.func @transform_16(%arg0: i32) -> (i32, i32) {
    %c0_i32 = arith.constant 0 : i32
    %c0_i32_0 = arith.constant 0 : i32
    %c0_i32_1 = arith.constant 0 : i32
    return %c0_i32, %c0_i32_0 : i32, i32
  }
  func.func @transform_17(%arg0: i32) -> (i32, i32) {
    %c0_i32 = arith.constant 0 : i32
    %c0_i32_0 = arith.constant 0 : i32
    %c0_i32_1 = arith.constant 0 : i32
    return %c0_i32, %c0_i32_0 : i32, i32
  }
  func.func @transform_18(%arg0: i32) -> (i32, i32, i32) {
    %c0_i32 = arith.constant 0 : i32
    %c0_i32_0 = arith.constant 0 : i32
    %c0_i32_1 = arith.constant 0 : i32
    return %arg0, %c0_i32, %c0_i32_0 : i32, i32, i32
  }
}

</mosaic_0001>

<bundles_post_ra>
// kernel: tpu_custom_call.1
= control target key start
LH: loop header
LB: loop body
LE: loop exit
PB: predicated region body
PF: predicated region fallthrough
CT: control target
= control target key end

     0   :  { %s2327_s0 = inlined_call_operand.vmem [shape: f32[2,8,32], index: 0, kind: input, shape index: {}]   ;;  %s2328_s1 = inlined_call_operand.vmem [shape: f32[2,8,8], index: 1, kind: input, shape index: {}]   ;;  %s2329_s2 = inlined_call_operand.vmem [shape: f32[1,32], index: 2, kind: input, shape index: {}]   ;;  %s2330_s3 = inlined_call_operand.vmem [shape: f32[1,32], index: 3, kind: input, shape index: {}]   ;;  %s2331_s4 = inlined_call_operand.vmem [shape: bf16[4,32,8], index: 4, kind: input, shape index: {}]   ;;  %s2332_s5 = inlined_call_operand.vmem [shape: f32[4,1,8], index: 5, kind: input, shape index: {}]   ;;  %s2333_s6 = inlined_call_operand.vmem [shape: bf16[4,32,8], index: 6, kind: input, shape index: {}]   ;;  %s2334_s7 = inlined_call_operand.vmem [shape: f32[4,1,8], index: 7, kind: input, shape index: {}]   ;;  %s2335_s8 = inlined_call_operand.vmem [shape: bf16[4,32,8], index: 8, kind: input, shape index: {}]   ;;  %s2336_s9 = inlined_call_operand.vmem [shape: f32[4,1,8], index: 9, kind: input, shape index: {}]   ;;  %s2337_s10 = inlined_call_operand.vmem [shape: bf16[4,8,32], index: 10, kind: input, shape index: {}]   ;;  %s2338_s11 = inlined_call_operand.vmem [shape: f32[1,32], index: 11, kind: input, shape index: {}]   ;;  %s2339_s12 = inlined_call_operand.vmem [shape: f32[1,32], index: 12, kind: input, shape index: {}]   ;;  %s2340_s13 = inlined_call_operand.vmem [shape: f32[1,32], index: 13, kind: input, shape index: {}]   ;;  %s2341_s14 = inlined_call_operand.vmem [shape: bf16[32,64], index: 14, kind: input, shape index: {}]   ;;  %s2342_s15 = inlined_call_operand.vmem [shape: f32[1,64], index: 15, kind: input, shape index: {}]   ;;  %s2343_s16 = inlined_call_operand.vmem [shape: bf16[64,32], index: 16, kind: input, shape index: {}]   ;;  %s2344_s17 = inlined_call_operand.vmem [shape: f32[1,32], index: 17, kind: input, shape index: {}]   ;;  %s2345_s18 = inlined_call_operand.hbm [shape: f32[2,8,32], index: 18, kind: output, shape index: {}]  }
   0x1   :  { %2351 = sst [smem:[#allocation9_spill]] %s2327_s0 }
   0x2   :  { %2352 = sst [smem:[#allocation10_spill]] %s2328_s1 }
   0x3   :  { %2353 = sst [smem:[#allocation11_spill]] %s2329_s2 }
   0x4   :  { %2354 = sst [smem:[#allocation12_spill]] %s2330_s3 }
   0x5   :  { %2355 = sst [smem:[#allocation13_spill]] %s2331_s4 }
   0x6   :  { %23 = vsyncpa [#allocation3], 0 }
   0x7   :  { %25 = vsyncpa [#allocation3 + $0x1], 0  ;;  %s2005_s27 = smov 0   ;;  %s2007_s28 = smov 0  }
   0x8   :  { %s2009_s29 = smov 0   ;;  %s2011_s30 = smov 0  }
   0x9 LB: > { %2356 = sst [smem:[#allocation5_spill]] %s1902_s29  ;;  %s2026_s0 = sadd.s32 4294967295, %s1906_s30   ;;  %s1906_s30 = sphi %s2011_s30, %s2369_s30   ;;  %s1902_s29 = sphi %s2009_s29, %s2371_s29   ;;  %s1898_s28 = sphi %s2007_s28, %s2373_s28   ;;  %s1894_s27 = sphi %s2005_s27, %s2372_s27  }
   0xa   : > { %s1571_s19 = sadd.s32 4294967294, %s1906_s30   ;;  %s2030_s1 = sadd.s32 1, %s1906_s30  }
   0xb   : > { %2357 = sst [smem:[#allocation6_spill]] %s2030_s1  ;;  %s426_s20 = sadd.s32 1, %s1902_s29 }
   0xc   : > { %s423_s21 = ssub.s32 %s1906_s30, %s2030_s1  ;;  %p436_p0 = scmp.ne.s32.totalorder %s1902_s29, %s1898_s28 }
   0xd   : > { %p424_p1 = scmp.eq.s32.totalorder %s423_s21, 0  ;;  %p437_p2 = scmp.eq.s32.totalorder %s2026_s0, 1 }
   0xe   : > { %p442_p3 = scmp.ne.s32.totalorder %s1898_s28, %s1894_s27  ;;  %p443_p4 = scmp.eq.s32.totalorder %s1571_s19, 1 }
   0xf   : > { %s2041_s22 = scalar_select %p424_p1, %s1902_s29, %s426_s20  }
  0x10   : > { %p2043_p5 = por %p437_p2, %p436_p0  ;;  %p2047_p6 = por %p443_p4, %p442_p3 }
  0x11   : > { %2358 = sst [smem:[#allocation7_spill]] %s2041_s22  ;;  %p1574_p7 = scmp.ge.s32.totalorder %s1906_s30, 1 }
  0x12   : > { %s2360_s23 = scalar_select %p2047_p6, 1, 0 }
  0x13   : > { %p523_p8 = scmp.lt.s32.totalorder %s1906_s30, 3 }
  0x14   : > { %2361 = sst [smem:[#allocation8_spill]] %s2360_s23 }
  0x15   : > { %p524_p9 = pnand %p1574_p7, %p523_p8 }
  0x16   : > { %p580_p10 = scmp.lt.s32.totalorder (!%p524_p9), %s2026_s0, 1  ;;  %s2362_s20 = sld [smem:[#allocation9_spill]] (!%p524_p9) }
  0x17   : > { %527 = sbr.rel (%p524_p9) target bundleno = 1693 (0x69d), region = 92  ;;  %s2363_s4 = sld [smem:[#allocation13_spill]] (!%p524_p9) }
  0x18   : > { %s2365_s3 = sld [smem:[#allocation12_spill]] (!%p524_p9) }
  0x1c   : > { %s2055_s24 = scalar_select %p580_p10, %s2026_s0, 1  ;;  %vm593_vm0 = vcmask 261120   ;;  %v1908_v2 = vmov 32.0   ;;  %v1737_v26 = vld [vmem:[%s2333_s6 + $0x8] sm:$0xff]  ;;  %v1739_v27 = vld [vmem:[%s2333_s6 + $0x18] sm:$0xff]  ;;  %v1736_v31 = vld [vmem:[%s2333_s6] sm:$0xff] }
  0x1d   : > { %1818 = vrcp.f32 %v1908_v2  ;;  %v1729_v15 = vld [vmem:[%s2363_s4 + $0x8] sm:$0xff]  ;;  %v1731_v16 = vld [vmem:[%s2363_s4 + $0x18] sm:$0xff]  ;;  %v1728_v20 = vld [vmem:[%s2363_s4] sm:$0xff]  ;;  %vm1044_vm4 = vcmask 64512   ;;  %vm1184_vm5 = vcmask 1043456   ;;  %vm1465_vm9 = vcmask 523264  }
  0x1e   : > { %s2346_s25 = sshll.u32 %s2055_s24, 3  ;;  %v1733_v17 = vld [vmem:[%s2363_s4 + $0x28] sm:$0xff]  ;;  %v1735_v19 = vld [vmem:[%s2363_s4 + $0x38] sm:$0xff]  ;;  %690 = vmatpush.bf16.msra.mxu0 %v1729_v15  ;;  %715 = vmatpush.bf16.msra.mxu1 %v1731_v16  ;;  %v1730_v21 = vld [vmem:[%s2363_s4 + $0x10] sm:$0xff]  ;;  %s2366_s26 = sshll.u32 %s2055_s24, 3 }
  0x1f   : > { %s583_s21 = scalar_lea.vmem %s2362_s20, %s2346_s25  ;;  %740 = vmatpush.bf16.msra.mxu2 %v1733_v17  ;;  %765 = vmatpush.bf16.msra.mxu3 %v1735_v19  ;;  %v1732_v22 = vld [vmem:[%s2363_s4 + $0x20] sm:$0xff]  ;;  %v1734_v23 = vld [vmem:[%s2363_s4 + $0x30] sm:$0xff]  ;;  %v1741_v28 = vld [vmem:[%s2333_s6 + $0x28] sm:$0xff]  ;;  %s2364_s25 = sld [smem:[#allocation11_spill]] }
  0x20   : > { %v2063_v0 = vld [vmem:[%s583_s21] sm:$0xff]  ;;  %v1743_v29 = vld [vmem:[%s2333_s6 + $0x38] sm:$0xff]  ;;  %v1738_v32 = vld [vmem:[%s2333_s6 + $0x10] sm:$0xff]  ;;  %s2367_s21 = sld [smem:[#allocation10_spill]]  ;;  %s1725_s20 = sshll.u32 %s2026_s0, 3 }
  0x21   : > { %v594_v1 = vsel %vm593_vm0, %v2063_v0, 0.0  ;;  %v1740_v33 = vld [vmem:[%s2333_s6 + $0x20] sm:$0xff]  ;;  %v1742_v34 = vld [vmem:[%s2333_s6 + $0x30] sm:$0xff]  ;;  %v1745_v50 = vld [vmem:[%s2335_s8 + $0x8] sm:$0xff]  ;;  %s1495_s23 = scalar_lea.hbm %s2345_s18, %s1725_s20 }
  0x22   : > { %595 = vadd.xlane.f32.xlu0 %v594_v1  ;;  %691 = vmatpush.bf16.msra.mxu0 %v1728_v20  ;;  %v1800_v45 = vld [vmem:[%s2365_s3] ss:$0 sm:$0xff]  ;;  %v1747_v51 = vld [vmem:[%s2335_s8 + $0x18] sm:$0xff]  ;;  %v1749_v52 = vld [vmem:[%s2335_s8 + $0x28] sm:$0xff]  ;;  %s1499_s1 = sshll.u32 %s1495_s23, 4  ;;  %s1500_s1 = int_to_ptr.hbm [resolvable:$true] %s1499_s1 }
  0x23   : > { %v1819_v3 = vpop.eup %1818  ;;  %716 = vmatpush.bf16.msra.mxu1 %v1730_v21  ;;  %741 = vmatpush.bf16.msra.mxu2 %v1732_v22  ;;  %v1751_v53 = vld [vmem:[%s2335_s8 + $0x38] sm:$0xff]  ;;  %v1744_v54 = vld [vmem:[%s2335_s8] sm:$0xff]  ;;  %v1746_v55 = vld [vmem:[%s2335_s8 + $0x10] sm:$0xff]  ;;  %s1858_s3 = sshra.s32 %s1500_s1, 4  ;;  %s1859_s3 = int_to_ptr.hbm [resolvable:$true] %s1858_s3 }
  0x24   : > { %v598_v4 = vmul.f32 32.0, %v1819_v3  ;;  %vm602_vm1 = vweird.f32 %v1819_v3  ;;  %766 = vmatpush.bf16.msra.mxu3 %v1734_v23  ;;  %v1748_v56 = vld [vmem:[%s2335_s8 + $0x20] sm:$0xff]  ;;  %v1750_v57 = vld [vmem:[%s2335_s8 + $0x30] sm:$0xff]  ;;  %p1865_p0 = scmp.lt.s32.totalorder %s1859_s3, %s2345_s18 }
  0x25   : > { %v1799_v43 = vld [vmem:[%s2364_s25] ss:$0 sm:$0xff]  ;;  %v1806_v2 = vld [vmem:[%s2334_s7 + $0x1] ss:$0 sm:$0xff]  ;;  %v1808_v15 = vld [vmem:[%s2334_s7 + $0x3] ss:$0 sm:$0xff] }
  0x26   : > { %v599_v5 = vsub.f32 1.0, %v598_v4  ;;  %822 = vmatpush.bf16.msrb.mxu0 %v1737_v26  ;;  %v1805_v1 = vld [vmem:[%s2334_s7] ss:$0 sm:$0xff]  ;;  %v1803_v26 = vld [vmem:[%s2332_s5 + $0x2] ss:$0 sm:$0xff]  ;;  %s587_s22 = scalar_lea.vmem %s2367_s21, %s2366_s26  ;;  %s577_s26 = sand.u32 1, %s1898_s28  }
  0x27   : > { %847 = vmatpush.bf16.msrb.mxu1 %v1739_v27  ;;  %872 = vmatpush.bf16.msrb.mxu2 %v1741_v28  ;;  %v1804_v27 = vld [vmem:[%s2332_s5 + $0x3] ss:$0 sm:$0xff]  ;;  %s1575_s19 = sshll.u32 %s577_s26, 3  ;;  %s1485_s0 = scalar_lea.sflag [#allocation3], %s577_s26 }
  0x28   : > { %v600_v6 = vmul.f32 %v1819_v3, %v599_v5  ;;  %897 = vmatpush.bf16.msrb.mxu3 %v1743_v29  ;;  %s579_s25 = scalar_lea.vmem [#allocation2], %s1575_s19  ;;  %s1860_s21 = scalar_lea.hbm %s1859_s3, 8 }
  0x29   : > { %s1497_s29 = sshll.u32 %s579_s25, 4  ;;  %p1861_p11 = scmp.ne.s32.totalorder %s1859_s3, %s1860_s21  ;;  %s1498_s29 = int_to_ptr.vmem [resolvable:$true] %s1497_s29 }
  0x2a   : > { %v601_v7 = vadd.f32 %v1819_v3, %v600_v6  ;;  %823 = vmatpush.bf16.msrb.mxu0 %v1736_v31  ;;  %s1864_s19 = scalar_lea.hbm %s2345_s18, 16 }
  0x2b   : > { %848 = vmatpush.bf16.msrb.mxu1 %v1738_v32  ;;  %873 = vmatpush.bf16.msrb.mxu2 %v1740_v33  ;;  %p1862_p12 = pnand %p1861_p11, %p2043_p5  ;;  %p1866_p1 = scmp.lt.s32.totalorder %s1864_s19, %s1860_s21 }
  0x2c   : > { %v2067_v8 = vsel %vm602_vm1, %v1819_v3, %v601_v7  ;;  %898 = vmatpush.bf16.msrb.mxu3 %v1742_v34  ;;  %v1809_v34 = vld [vmem:[%s2336_s9] ss:$0 sm:$0xff] }
  0x2d   : > { %p1863_p13 = pneg %p1862_p12  ;;  %p1867_p2 = por %p1866_p1, %p1865_p0 }
  0x2f   : > { %p1868_p3 = pnand %p1867_p2, %p1863_p13 }
  0x95   : > { %v596_v9 = vpop.xlane.xlu0 %595 }
  0x96   : > { %v604_v10 = vmul.f32 %v2067_v8, %v596_v9 }
  0x98   : > { %v605_v11 = vsub.f32 %v2063_v0, %v604_v10  ;;  %v1801_v10 = vld [vmem:[%s2332_s5] ss:$0 sm:$0xff] }
  0x9a   : > { %v606_v12 = vmul.f32 %v605_v11, %v605_v11 }
  0x9c   : > { %v607_v13 = vsel %vm593_vm0, %v606_v12, 0.0 }
  0x9d   : > { %608 = vadd.xlane.f32.xlu0 %v607_v13  ;;  %v1802_v13 = vld [vmem:[%s2332_s5 + $0x1] ss:$0 sm:$0xff] }
 0x110   : > { %v609_v14 = vpop.xlane.xlu0 %608 }
 0x111   : > { %v610_v18 = vmul.f32 0.032258064, %v609_v14  ;;  %v1807_v14 = vld [vmem:[%s2334_s7 + $0x2] ss:$0 sm:$0xff] }
 0x113   : > { %1820 = vrsqrt.f32 %v610_v18  ;;  %vm618_vm2 = vcmp.eq.f32.partialorder %v610_v18, inf  ;;  %v621_v39 = vand.u32 2147483648, %v610_v18  ;;  %vm620_vm3 = vcmp.eq.f32.partialorder %v610_v18, 0.0 }
 0x119   : > { %v1821_v24 = vpop.eup %1820 }
 0x11a   : > { %v612_v25 = vmul.f32 %v1821_v24, %v610_v18 }
 0x11c   : > { %v613_v30 = vmul.f32 %v1821_v24, %v612_v25 }
 0x11e   : > { %v614_v35 = vmul.f32 0.5, %v613_v30 }
 0x120   : > { %v615_v36 = vsub.f32 1.5, %v614_v35  ;;  %v1810_v35 = vld [vmem:[%s2336_s9 + $0x1] ss:$0 sm:$0xff] }
 0x122   : > { %v616_v37 = vmul.f32 %v1821_v24, %v615_v36 }
 0x124   : > { %v617_v38 = vmul.f32 %v616_v37, %v610_v18 }
 0x126   : > { %v619_v40 = vsel %vm618_vm2, %v610_v18, %v617_v38 }
 0x127   : > { %v622_v41 = vsel %vm620_vm3, %v621_v39, %v619_v40 }
 0x128   : > { %v623_v42 = vadd.f32 1e-06, %v622_v41 }
 0x12a   : > { %1822 = vrcp.f32 %v623_v42 }
 0x130   : > { %v1823_v44 = vpop.eup %1822 }
 0x131   : > { %v626_v46 = vmul.f32 %v1823_v44, %v605_v11 }
 0x133   : > { %v630_v47 = vmul.f32 %v1799_v43, %v626_v46 }
 0x135   : > { %v635_v48 = vadd.f32 %v1800_v45, %v630_v47 }
 0x137   : > { %v636_v49 = vpack.c.bf16 %v635_v48, %v635_v48  ;;  %v1811_v48 = vld [vmem:[%s2336_s9 + $0x2] ss:$0 sm:$0xff] }
 0x139   : > { %1586 = vmatmul.msk.bf16.vlgmr.msra.gmra.mxu0 %vm593_vm0, %v636_v49  ;;  %1595 = vmatmul.msk.bf16.vlgmr.msra.gmra.mxu1 %vm593_vm0, %v636_v49 }
 0x13a   : > { %1604 = vmatmul.msk.bf16.vlgmr.msra.gmra.mxu2 %vm593_vm0, %v636_v49  ;;  %1613 = vmatmul.msk.bf16.vlgmr.msra.gmra.mxu3 %vm593_vm0, %v636_v49 }
 0x13b   : > { %954 = vmatpush.bf16.msra.mxu0 %v1745_v50  ;;  %979 = vmatpush.bf16.msra.mxu1 %v1747_v51 }
 0x13c   : > { %1004 = vmatpush.bf16.msra.mxu2 %v1749_v52  ;;  %1029 = vmatpush.bf16.msra.mxu3 %v1751_v53 }
 0x13f   : > { %955 = vmatpush.bf16.msra.mxu0 %v1744_v54  ;;  %980 = vmatpush.bf16.msra.mxu1 %v1746_v55 }
 0x140   : > { %1005 = vmatpush.bf16.msra.mxu2 %v1748_v56  ;;  %1030 = vmatpush.bf16.msra.mxu3 %v1750_v57 }
 0x149   : > { %1622 = vmatmul.msk.bf16.vlgmr.msrb.gmra.mxu0 %vm593_vm0, %v636_v49  ;;  %1631 = vmatmul.msk.bf16.vlgmr.msrb.gmra.mxu1 %vm593_vm0, %v636_v49 }
 0x14a   : > { %1640 = vmatmul.msk.bf16.vlgmr.msrb.gmra.mxu2 %vm593_vm0, %v636_v49  ;;  %1649 = vmatmul.msk.bf16.vlgmr.msrb.gmra.mxu3 %vm593_vm0, %v636_v49 }
 0x159   : > { %1658 = vmatmul.msk.bf16.vlgmr.msra.gmra.mxu0 %vm593_vm0, %v636_v49  ;;  %1667 = vmatmul.msk.bf16.vlgmr.msra.gmra.mxu1 %vm593_vm0, %v636_v49 }
 0x15a   : > { %1676 = vmatmul.msk.bf16.vlgmr.msra.gmra.mxu2 %vm593_vm0, %v636_v49  ;;  %1685 = vmatmul.msk.bf16.vlgmr.msra.gmra.mxu3 %vm593_vm0, %v636_v49  ;;  %v1812_v49 = vld [vmem:[%s2336_s9 + $0x3] ss:$0 sm:$0xff] }
 0x1b6   : > { %v693_v58 = vpop.f32.mrf.mxu0  ;;  %v718_v59 = vpop.f32.mrf.mxu1 }
 0x1b7   : > { %v694_v20 = vadd.f32 %v1801_v10, %v693_v58  ;;  %v719_v21 = vadd.f32 %v1802_v13, %v718_v59 }
 0x1b9   : > { %v1036_v30 = vpack.c.bf16 %v694_v20, %v694_v20  ;;  %v1037_v31 = vpack.c.bf16 %v719_v21, %v719_v21 }
 0x1bd   : > { %v743_v60 = vpop.f32.mrf.mxu2  ;;  %v768_v61 = vpop.f32.mrf.mxu3 }
 0x1be   : > { %v695_v62 = vpop.f32.mrf.mxu0  ;;  %v720_v63 = vpop.f32.mrf.mxu1  ;;  %v744_v36 = vadd.f32 %v1803_v26, %v743_v60  ;;  %v769_v37 = vadd.f32 %v1804_v27, %v768_v61 }
 0x1c0   : > { %v1038_v44 = vpack.c.bf16 %v744_v36, %v744_v36  ;;  %v1039_v45 = vpack.c.bf16 %v769_v37, %v769_v37 }
 0x1c5   : > { %v745_v3 = vpop.f32.mrf.mxu2  ;;  %v770_v4 = vpop.f32.mrf.mxu3 }
 0x1c6   : > { %v825_v5 = vpop.f32.mrf.mxu0  ;;  %v850_v6 = vpop.f32.mrf.mxu1  ;;  %v1909_v4 = vmov 0.0  }
 0x1c7   : > { %v826_v7 = vadd.f32 %v1805_v1, %v825_v5  ;;  %v851_v9 = vadd.f32 %v1806_v2, %v850_v6  ;;  %v590_v1 = vld [vmem:[%s587_s22] sm:$0xff] }
 0x1c8   : > { %vm591_vm6 = vcmp.eq.f32.partialorder %v590_v1, 0.0 }
 0x1c9   : > { %v1040_v11 = vpack.c.bf16 %v826_v7, %v826_v7  ;;  %v1041_v12 = vpack.c.bf16 %v851_v9, %v851_v9  ;;  %v592_v5 = vsel %vm591_vm6, -1e+09, %v1909_v4  ;;  %v1265_v4 = vld [vmem:[%s2337_s10 + $0xc] sm:$0xf] }
 0x1cb   : > { %v1049_v16 = vsel %vm1044_vm4, %v1040_v11, 0  ;;  %v1068_v17 = vsel %vm1044_vm4, %v1041_v12, 0 }
 0x1cc   : > { %1058 = vmatpush.bf16.xpose.msrb.mxu0 %v1049_v16  ;;  %1077 = vmatpush.bf16.xpose.msrb.mxu1 %v1068_v17 }
 0x1cd   : > { %v875_v18 = vpop.f32.mrf.mxu2  ;;  %v900_v19 = vpop.f32.mrf.mxu3 }
 0x1ce   : > { %v876_v22 = vadd.f32 %v1807_v14, %v875_v18  ;;  %v901_v23 = vadd.f32 %v1808_v15, %v900_v19  ;;  %v827_v24 = vpop.f32.mrf.mxu0  ;;  %v852_v25 = vpop.f32.mrf.mxu1 }
 0x1d0   : > { %v1042_v28 = vpack.c.bf16 %v876_v22, %v876_v22  ;;  %v1043_v29 = vpack.c.bf16 %v901_v23, %v901_v23 }
 0x1d2   : > { %v1087_v32 = vsel %vm1044_vm4, %v1042_v28, 0  ;;  %v1106_v33 = vsel %vm1044_vm4, %v1043_v29, 0 }
 0x1d3   : > { %1096 = vmatpush.bf16.xpose.msrb.mxu2 %v1087_v32  ;;  %1115 = vmatpush.bf16.xpose.msrb.mxu3 %v1106_v33 }
 0x1d4   : > { %1686 = vmatmul.msk.bf16.vlgmr.msrb.gmra.mxu0 %vm1044_vm4, %v1036_v30  ;;  %1687 = vmatmul.msk.bf16.vlgmr.msrb.gmra.mxu1 %vm1044_vm4, %v1037_v31 }
 0x1d5   : > { %v877_v38 = vpop.f32.mrf.mxu2  ;;  %v902_v39 = vpop.f32.mrf.mxu3 }
 0x1d6   : > { %v957_v40 = vpop.f32.mrf.mxu0  ;;  %v982_v41 = vpop.f32.mrf.mxu1 }
 0x1d7   : > { %v958_v42 = vadd.f32 %v1809_v34, %v957_v40  ;;  %v983_v43 = vadd.f32 %v1810_v35, %v982_v41 }
 0x1d9   : > { %v1177_v46 = vpack.c.bf16 %v958_v42, %v958_v42  ;;  %v1178_v47 = vpack.c.bf16 %v983_v43, %v983_v43 }
 0x1da   : > { %1688 = vmatmul.msk.bf16.vlgmr.msrb.gmra.mxu2 %vm1044_vm4, %v1038_v44  ;;  %1689 = vmatmul.msk.bf16.vlgmr.msrb.gmra.mxu3 %vm1044_vm4, %v1039_v45 }
 0x1db   : > { %v1186_v50 = vsel %vm1184_vm5, %v1177_v46, 0  ;;  %v1205_v51 = vsel %vm1184_vm5, %v1178_v47, 0 }
 0x1dc   : > { %1195 = vmatpush.bf16.msra.mxu0 %v1186_v50  ;;  %1214 = vmatpush.bf16.msra.mxu1 %v1205_v51 }
 0x1dd   : > { %v1007_v52 = vpop.f32.mrf.mxu2  ;;  %v1032_v53 = vpop.f32.mrf.mxu3 }
 0x1de   : > { %v1008_v54 = vadd.f32 %v1811_v48, %v1007_v52  ;;  %v1033_v55 = vadd.f32 %v1812_v49, %v1032_v53  ;;  %v959_v56 = vpop.f32.mrf.mxu0  ;;  %v984_v57 = vpop.f32.mrf.mxu1 }
 0x1e0   : > { %v1179_v58 = vpack.c.bf16 %v1008_v54, %v1008_v54  ;;  %v1180_v59 = vpack.c.bf16 %v1033_v55, %v1033_v55 }
 0x1e2   : > { %v1224_v60 = vsel %vm1184_vm5, %v1179_v58, 0  ;;  %v1243_v61 = vsel %vm1184_vm5, %v1180_v59, 0 }
 0x1e3   : > { %1233 = vmatpush.bf16.msra.mxu2 %v1224_v60  ;;  %1252 = vmatpush.bf16.msra.mxu3 %v1243_v61  ;;  %v1262_v61 = vld [vmem:[%s2337_s10] sm:$0xf] }
 0x1e5   : > { %v1009_v62 = vpop.f32.mrf.mxu2  ;;  %v1034_v63 = vpop.f32.mrf.mxu3 }
 0x1e6   : > { %v1270_v62 = vsel %vm1184_vm5, %v1262_v61, 0  ;;  %v1264_v63 = vld [vmem:[%s2337_s10 + $0x8] sm:$0xf]  ;;  %v1815_v61 = vld [vmem:[%s2340_s13] ss:$0 sm:$0xff] }
 0x1e7   : > { %1279 = vmatpush.bf16.msrb.mxu0 %v1270_v62  ;;  %v1308_v1 = vsel %vm1184_vm5, %v1264_v63, 0 }
 0x1e8   : > { %1317 = vmatpush.bf16.msrb.mxu2 %v1308_v1 }
 0x251   : > { %v1060_v2 = vpop.f32.mrf.mxu0  ;;  %v1079_v3 = vpop.f32.mrf.mxu1 }
 0x252   : > { %v1121_v6 = vmul.f32 0.35355338, %v1060_v2  ;;  %v1122_v9 = vmul.f32 0.35355338, %v1079_v3  ;;  %v1263_v2 = vld [vmem:[%s2337_s10 + $0x4] sm:$0xf] }
 0x253   : > { %v1289_v3 = vsel %vm1184_vm5, %v1263_v2, 0  ;;  %v1755_v2 = vld [vmem:[%s2343_s16 + $0x8] sm:$0xff] }
 0x254   : > { %v1125_v7 = vadd.f32 %v1121_v6, %v592_v5  ;;  %v1126_v13 = vadd.f32 %v1122_v9, %v592_v5  ;;  %1298 = vmatpush.bf16.msrb.mxu1 %v1289_v3  ;;  %v1754_v3 = vld [vmem:[%s2343_s16] sm:$0xff] }
 0x256   : > { %v1129_v10 = vsel %vm1044_vm4, %v1125_v7, -inf  ;;  %v1132_v17 = vsel %vm1044_vm4, %v1126_v13, -inf }
 0x257   : > { %1130 = vmax.xlane.f32.xlu2 %v1129_v10 }
 0x259   : > { %v1062_v11 = vpop.f32.mrf.mxu0  ;;  %v1081_v12 = vpop.f32.mrf.mxu1 }
 0x25d   : > { %v1098_v14 = vpop.f32.mrf.mxu2  ;;  %v1117_v15 = vpop.f32.mrf.mxu3 }
 0x25e   : > { %v1123_v16 = vmul.f32 0.35355338, %v1098_v14  ;;  %v1124_v19 = vmul.f32 0.35355338, %v1117_v15 }
 0x25f   : > { %1133 = vmax.xlane.f32.xlu2 %v1132_v17 }
 0x260   : > { %v1127_v18 = vadd.f32 %v1123_v16, %v592_v5  ;;  %v1128_v23 = vadd.f32 %v1124_v19, %v592_v5  ;;  %v1327_v5 = vsel %vm1184_vm5, %v1265_v4, 0  ;;  %v1816_v4 = vld [vmem:[%s2342_s15] ss:$0 sm:$0xff] }
 0x261   : > { %1336 = vmatpush.bf16.msrb.mxu3 %v1327_v5 }
 0x262   : > { %v1135_v20 = vsel %vm1044_vm4, %v1127_v18, -inf  ;;  %v1138_v24 = vsel %vm1044_vm4, %v1128_v23, -inf }
 0x263   : > { %1136 = vmax.xlane.f32.xlu1 %v1135_v20 }
 0x265   : > { %v1100_v21 = vpop.f32.mrf.mxu2  ;;  %v1119_v22 = vpop.f32.mrf.mxu3 }
 0x26b   : > { %1139 = vmax.xlane.f32.xlu1 %v1138_v24 }
 0x2ca   : > { %v1131_v25 = vpop.xlane.xlu2 %1130 }
 0x2cb   : > { %v1141_v26 = vsub.f32 %v1125_v7, %v1131_v25 }
 0x2cd   : > { %v1145_v27 = vmul.f32 1.442695, %v1141_v26 }
 0x2cf   : > { %1824 = vpow2.f32 %v1145_v27 }
 0x2d2   : > { %v1134_v29 = vpop.xlane.xlu2 %1133 }
 0x2d3   : > { %v1142_v33 = vsub.f32 %v1126_v13, %v1134_v29 }
 0x2d5   : > { %v1825_v28 = vpop.eup %1824  ;;  %v1147_v35 = vmul.f32 1.442695, %v1142_v33 }
 0x2d6   : > { %v1137_v30 = vpop.xlane.xlu1 %1136  ;;  %v1153_v31 = vsel %vm1044_vm4, %v1825_v28, 0.0 }
 0x2d7   : > { %v1143_v32 = vsub.f32 %v1127_v18, %v1137_v30  ;;  %1154 = vadd.xlane.f32.xlu2 %v1153_v31  ;;  %v1813_v31 = vld [vmem:[%s2338_s11] ss:$0 sm:$0xff] }
 0x2d9   : > { %v1149_v34 = vmul.f32 1.442695, %v1143_v32 }
 0x2db   : > { %1826 = vpow2.f32 %v1149_v34 }
 0x2dc   : > { %1828 = vpow2.f32 %v1147_v35 }
 0x2de   : > { %v1140_v36 = vpop.xlane.xlu1 %1139 }
 0x2df   : > { %v1144_v37 = vsub.f32 %v1128_v23, %v1140_v36 }
 0x2e1   : > { %v1827_v38 = vpop.eup %1826  ;;  %v1151_v39 = vmul.f32 1.442695, %v1144_v37 }
 0x2e2   : > { %v1159_v40 = vsel %vm1044_vm4, %v1827_v38, 0.0  ;;  %v1829_v41 = vpop.eup %1828 }
 0x2e3   : > { %1830 = vpow2.f32 %v1151_v39  ;;  %1160 = vadd.xlane.f32.xlu0 %v1159_v40  ;;  %v1156_v44 = vsel %vm1044_vm4, %v1829_v41, 0.0 }
 0x2e9   : > { %v1831_v42 = vpop.eup %1830 }
 0x2ea   : > { %v1162_v43 = vsel %vm1044_vm4, %v1831_v42, 0.0 }
 0x2eb   : > { %1163 = vadd.xlane.f32.xlu1 %v1162_v43  ;;  %1157 = vadd.xlane.f32.xlu0 %v1156_v44  ;;  %v1753_v43 = vld [vmem:[%s2341_s14 + $0x8] sm:$0xff] }
 0x34a   : > { %v1155_v45 = vpop.xlane.xlu2 %1154 }
 0x34b   : > { %1832 = vrcp.f32 %v1155_v45 }
 0x351   : > { %v1833_v46 = vpop.eup %1832 }
 0x352   : > { %v1169_v47 = vmul.f32 %v1833_v46, %v1825_v28  ;;  %v1757_v46 = vld [vmem:[%s2343_s16 + $0x18] sm:$0xff] }
 0x354   : > { %v1173_v48 = vpack.c.bf16 %v1169_v47, %v1169_v47 }
 0x356   : > { %v1161_v49 = vpop.xlane.xlu0 %1160  ;;  %1690 = vmatmul.msk.bf16.vlgmr.msra.gmra.mxu0 %vm1044_vm4, %v1173_v48  ;;  %v1756_v48 = vld [vmem:[%s2343_s16 + $0x10] sm:$0xff] }
 0x357   : > { %1834 = vrcp.f32 %v1161_v49  ;;  %1420 = vmatpush.bf16.msra.mxu0 %v1753_v43 }
 0x35d   : > { %v1835_v50 = vpop.eup %1834 }
 0x35e   : > { %v1171_v51 = vmul.f32 %v1835_v50, %v1827_v38  ;;  %v1164_v52 = vpop.xlane.xlu1 %1163  ;;  %v1158_v53 = vpop.xlane.xlu0 %1157 }
 0x35f   : > { %1836 = vrcp.f32 %v1164_v52 }
 0x360   : > { %v1175_v54 = vpack.c.bf16 %v1171_v51, %v1171_v51  ;;  %1838 = vrcp.f32 %v1158_v53 }
 0x362   : > { %1692 = vmatmul.msk.bf16.vlgmr.msra.gmra.mxu2 %vm1044_vm4, %v1175_v54 }
 0x365   : > { %v1837_v55 = vpop.eup %1836 }
 0x366   : > { %v1839_v56 = vpop.eup %1838  ;;  %v1172_v57 = vmul.f32 %v1837_v55, %v1831_v42 }
 0x367   : > { %v1170_v58 = vmul.f32 %v1839_v56, %v1829_v41 }
 0x368   : > { %v1176_v59 = vpack.c.bf16 %v1172_v57, %v1172_v57 }
 0x369   : > { %v1174_v60 = vpack.c.bf16 %v1170_v58, %v1170_v58  ;;  %v1814_v58 = vld [vmem:[%s2339_s12] ss:$0 sm:$0xff] }
 0x36a   : > { %1693 = vmatmul.msk.bf16.vlgmr.msra.gmra.mxu3 %vm1044_vm4, %v1176_v59 }
 0x36b   : > { %1691 = vmatmul.msk.bf16.vlgmr.msra.gmra.mxu1 %vm1044_vm4, %v1174_v60 }
 0x36c   : > { %1473 = vmatpush.bf16.msra.mxu1 %v1757_v46 }
 0x370   : > { %1474 = vmatpush.bf16.msra.mxu1 %v1756_v48 }
 0x374   : > { %1475 = vmatpush.bf16.msra.mxu1 %v1755_v2 }
 0x378   : > { %1476 = vmatpush.bf16.msra.mxu1 %v1754_v3 }
 0x3d3   : > { %v1197_v6 = vpop.f32.mrf.mxu0 }
 0x3d4   : > { %v1258_v7 = vpack.c.bf16 %v1197_v6, %v1197_v6 }
 0x3d6   : > { %1694 = vmatmul.msk.bf16.vlgmr.msrb.gmra.mxu0 %vm1044_vm4, %v1258_v7 }
 0x3db   : > { %v1199_v9 = vpop.f32.mrf.mxu0 }
 0x3e5   : > { %v1235_v10 = vpop.f32.mrf.mxu2 }
 0x3e6   : > { %v1260_v11 = vpack.c.bf16 %v1235_v10, %v1235_v10 }
 0x3e8   : > { %v1216_v12 = vpop.f32.mrf.mxu1  ;;  %1696 = vmatmul.msk.bf16.vlgmr.msrb.gmra.mxu2 %vm1044_vm4, %v1260_v11  ;;  %v1817_v11 = vld [vmem:[%s2344_s17] ss:$0 sm:$0xff] }
 0x3e9   : > { %v1259_v13 = vpack.c.bf16 %v1216_v12, %v1216_v12 }
 0x3eb   : > { %1695 = vmatmul.msk.bf16.vlgmr.msrb.gmra.mxu1 %vm1044_vm4, %v1259_v13 }
 0x3ed   : > { %v1237_v14 = vpop.f32.mrf.mxu2  ;;  %v1254_v15 = vpop.f32.mrf.mxu3 }
 0x3ee   : > { %v1261_v16 = vpack.c.bf16 %v1254_v15, %v1254_v15 }
 0x3f0   : > { %v1218_v17 = vpop.f32.mrf.mxu1  ;;  %1697 = vmatmul.msk.bf16.vlgmr.msrb.gmra.mxu3 %vm1044_vm4, %v1261_v16 }
 0x3f5   : > { %v1256_v18 = vpop.f32.mrf.mxu3 }
 0x453   : > { %v1281_v19 = vpop.f32.mrf.mxu0 }
 0x454   : > { %v1342_v24 = vsel %vm593_vm0, %v1281_v19, 0.0 }
 0x45b   : > { %v1283_v20 = vpop.f32.mrf.mxu0 }
 0x468   : > { %v1300_v21 = vpop.f32.mrf.mxu1 }
 0x469   : > { %v1343_v23 = vsel %vm593_vm0, %v1300_v21, 0.0 }
 0x46a   : > { %v1344_v27 = vadd.f32 %v1343_v23, %v1342_v24 }
 0x46b   : > { %v1319_v22 = vpop.f32.mrf.mxu2 }
 0x46c   : > { %v1345_v25 = vsel %vm593_vm0, %v1319_v22, 0.0 }
 0x46d   : > { %v1346_v28 = vadd.f32 %v1345_v25, %v1344_v27 }
 0x470   : > { %v1302_v26 = vpop.f32.mrf.mxu1 }
 0x473   : > { %v1321_v29 = vpop.f32.mrf.mxu2  ;;  %v1338_v30 = vpop.f32.mrf.mxu3 }
 0x474   : > { %v1347_v32 = vsel %vm593_vm0, %v1338_v30, 0.0 }
 0x475   : > { %v1348_v33 = vadd.f32 %v1347_v32, %v1346_v28 }
 0x477   : > { %v1353_v34 = vadd.f32 %v1813_v31, %v1348_v33 }
 0x479   : > { %v2255_v35 = vadd.f32 %v1353_v34, %v2063_v0  ;;  %v1752_v0 = vld [vmem:[%s2341_s14] sm:$0xff] }
 0x47a   : > { %1421 = vmatpush.bf16.msra.mxu0 %v1752_v0 }
 0x47b   : > { %v1340_v36 = vpop.f32.mrf.mxu3  ;;  %v1355_v37 = vsel %vm593_vm0, %v2255_v35, 0.0 }
 0x47c   : > { %1356 = vadd.xlane.f32.xlu1 %v1355_v37 }
 0x4ef   : > { %v1357_v38 = vpop.xlane.xlu1 %1356 }
 0x4f0   : > { %v1358_v39 = vmul.f32 %v1357_v38, %v2067_v8 }
 0x4f2   : > { %v1359_v40 = vsub.f32 %v2255_v35, %v1358_v39 }
 0x4f4   : > { %v1360_v41 = vmul.f32 %v1359_v40, %v1359_v40 }
 0x4f6   : > { %v1361_v42 = vsel %vm593_vm0, %v1360_v41, 0.0 }
 0x4f7   : > { %1362 = vadd.xlane.f32.xlu2 %v1361_v42 }
 0x56a   : > { %v1363_v44 = vpop.xlane.xlu2 %1362 }
 0x56b   : > { %v1364_v45 = vmul.f32 0.032258064, %v1363_v44 }
 0x56d   : > { %1840 = vrsqrt.f32 %v1364_v45  ;;  %vm1372_vm7 = vcmp.eq.f32.partialorder %v1364_v45, inf  ;;  %v1375_v54 = vand.u32 2147483648, %v1364_v45  ;;  %vm1374_vm8 = vcmp.eq.f32.partialorder %v1364_v45, 0.0 }
 0x573   : > { %v1841_v8 = vpop.eup %1840 }
 0x574   : > { %v1366_v47 = vmul.f32 %v1841_v8, %v1364_v45 }
 0x576   : > { %v1367_v49 = vmul.f32 %v1841_v8, %v1366_v47 }
 0x578   : > { %v1368_v50 = vmul.f32 0.5, %v1367_v49 }
 0x57a   : > { %v1369_v51 = vsub.f32 1.5, %v1368_v50 }
 0x57c   : > { %v1370_v52 = vmul.f32 %v1841_v8, %v1369_v51 }
 0x57e   : > { %v1371_v53 = vmul.f32 %v1370_v52, %v1364_v45 }
 0x580   : > { %v1373_v55 = vsel %vm1372_vm7, %v1364_v45, %v1371_v53 }
 0x581   : > { %v1376_v56 = vsel %vm1374_vm8, %v1375_v54, %v1373_v55 }
 0x582   : > { %v1377_v57 = vadd.f32 1e-06, %v1376_v56 }
 0x584   : > { %1842 = vrcp.f32 %v1377_v57 }
 0x58a   : > { %v1843_v59 = vpop.eup %1842 }
 0x58b   : > { %v1380_v60 = vmul.f32 %v1843_v59, %v1359_v40 }
 0x58d   : > { %v1384_v62 = vmul.f32 %v1814_v58, %v1380_v60 }
 0x58f   : > { %v1389_v63 = vadd.f32 %v1815_v61, %v1384_v62 }
 0x591   : > { %v1390_v1 = vpack.c.bf16 %v1389_v63, %v1389_v63 }
 0x593   : > { %1706 = vmatmul.msk.bf16.vlgmr.msra.gmra.mxu0 %vm593_vm0, %v1390_v1 }
 0x610   : > { %v1423_v5 = vpop.f32.mrf.mxu0 }
 0x611   : > { %v1424_v6 = vadd.f32 %v1816_v4, %v1423_v5 }
 0x613   : > { %v1427_v7 = vmax.f32 %v1424_v6, 0.0 }
 0x615   : > { %v1428_v9 = vpack.c.bf16 %v1427_v7, %v1427_v7 }
 0x617   : > { %1723 = vmatmul.msk.bf16.vlgmr.msra.gmra.mxu1 %vm1465_vm9, %v1428_v9 }
 0x618   : > { %v1425_v10 = vpop.f32.mrf.mxu0 }
 0x694   : > { %v1478_v12 = vpop.f32.mrf.mxu1 }
 0x695   : > { %v1479_v13 = vadd.f32 %v1817_v11, %v1478_v12 }
 0x697   : > { %v1482_v14 = vadd.f32 %v1479_v13, %v2255_v35 }
 0x699   : > { %1483 = vst.msk [vmem:[%s579_s25] sm:$0xff] %vm593_vm0, %v1482_v14 }
 0x69a   : > { %1871 = shalt.err (!%p1868_p3)
}
 0x69b   : > { %1758 = dma.vmem_to_hbm [thread:$0]  (%p2043_p5), %s1498_s29, 128, %s1500_s1, %s1485_s0  }
 0x69c   : > { %v1480_v15 = vpop.f32.mrf.mxu1 }
 0x69d PF: > { %p1764_p4 = scmp.ge.s32.totalorder %s1906_s30, 2  ;;  %s1511_s23 = sand.u32 1, %s1894_s27  }
 0x69e   : > { %s1512_s25 = scalar_lea.sflag [#allocation3], %s1511_s23 }
 0x69f   : > { %p1761_p7 = pnand %p1764_p4, %p2047_p6 }
 0x6a1   : > { %p1762_p8 = pneg %p1761_p7 }
 0x6a3   : > { %1889 = dma.done.wait (%p1762_p8), %s1512_s25, 128  }
 0x6a4   : > { %1891 = vsyncadd (%p1762_p8), %s1512_s25, 4294967168  ;;  %s2369_s30 = sld [smem:[#allocation6_spill]]  ;;  %s2372_s27 = smov %s1898_s28 }
 0x6a5   : > { %s2370_s3 = sld [smem:[#allocation5_spill]] }
 0x6a6   : > { %s2371_s29 = sld [smem:[#allocation7_spill]] }
 0x6aa   : > { %p28_p9 = scmp.ge.s32.totalorder %s2369_s30, 4  }
 0x6ab   : > { %s2373_s28 = smov %s2370_s3 }
 0x6ac   :  { %30 = sbr.rel (!%p28_p9) target bundleno = 9 (0x9), region = 130 }
 0x6b1   :  { %1518 = vsyncpa [#allocation3], 1 }
 0x6b2   :  { %1520 = vsyncpa [#allocation3 + $0x1], 1 }

</bundles_post_ra>
